<compile_context>
chip_gen: v5e
topology: v5e:2x2
jax: 0.10.0
libtpu: 0.0.40
codegen_flags: <defaults>
</compile_context>

<pallas_src>
import functools

import jax
import jax.numpy as jnp
from jax.experimental import pallas as pl
from jax.experimental.pallas import tpu as pltpu


def attention_kernel(x_ref, gamma_ref, beta_ref, wqkv_ref, wo_ref, bo_ref,
                     o_ref, *, heads, dim_head, eps, scale):
    """One grid step == one batch tile (block_b batch elements)."""
    Bt, N, D = x_ref.shape
    M = Bt * N
    inner = heads * dim_head

    # ---- LayerNorm in f32 (biased variance, matches nn.LayerNorm) ----------
    # (Bt, N, D) -> (M, D) merges leading dims only (free when N % 8 == 0 f32).
    x = x_ref[...].reshape(M, D).astype(jnp.float32)
    mean = jnp.mean(x, axis=-1, keepdims=True)
    xc = x - mean
    var = jnp.mean(xc * xc, axis=-1, keepdims=True)
    xn = xc * jax.lax.rsqrt(var + eps) * gamma_ref[...] + beta_ref[...]
    xn_bf = xn.astype(jnp.bfloat16)                        # bf16 MXU operand

    # ---- fused Q/K/V projection: one wide matmul ---------------------------
    qkv = jnp.dot(xn_bf, wqkv_ref[...],
                  preferred_element_type=jnp.float32)      # (M, 3*inner) f32

    def split_heads(mat):
        # (M, inner) f32 -> (heads*Bt, N, dim_head) bf16, head-major batch.
        parts = [
            mat[:, h * dim_head:(h + 1) * dim_head].reshape(Bt, N, dim_head)
            for h in range(heads)
        ]
        return jnp.concatenate(parts, axis=0).astype(jnp.bfloat16)

    q = split_heads(qkv[:, :inner] * scale)                # softmax scale folded into Q
    k = split_heads(qkv[:, inner:2 * inner])
    v = split_heads(qkv[:, 2 * inner:])

    # ---- attention: heads folded into the leading batch axis ---------------
    s = jnp.einsum('bqd,bkd->bqk', q, k,
                   preferred_element_type=jnp.float32)     # (H*Bt, N, N) f32
    s = s - jnp.max(s, axis=-1, keepdims=True)
    e = jnp.exp(s)
    denom = jnp.sum(e, axis=-1, keepdims=True)
    # EUP reciprocal (separate slot, ~free); use approx=False for training.
    p = (e * pl.reciprocal(denom, approx=True)).astype(jnp.bfloat16)
    o3 = jnp.einsum('bqk,bkd->bqd', p, v,
                    preferred_element_type=jnp.float32)    # (H*Bt, N, dh) f32

    # ---- pack heads on the lane axis, fused output projection --------------
    o_cat = jnp.concatenate(
        [o3[h * Bt:(h + 1) * Bt].reshape(M, dim_head) for h in range(heads)],
        axis=-1).astype(jnp.bfloat16)                      # (M, inner) bf16
    y = jnp.dot(o_cat, wo_ref[...],
                preferred_element_type=jnp.float32) + bo_ref[...]
    o_ref[...] = y.reshape(Bt, N, D).astype(o_ref.dtype)
    # TODO(synk): dropout is a no-op (p=0.0 / eval); training-mode dropout
    #             would need pltpu.prng_seed / prng_random_bits.


def _vmem_capacity_bytes():
    cap = 64 * 1024 * 1024                      # conservative (v7x-sized) fallback
    try:
        info = pltpu.get_tpu_info()
        cap = int(getattr(info, "vmem_capacity_bytes", cap)) or cap
    except Exception:
        pass
    return cap


def _tile_vmem_bytes(bt, N, D, heads, dim_head):
    """Rough per-step VMEM footprint: double-buffered I/O tiles + weight
    buffers + live f32/bf16 intermediates (incl. the N^2 score storage)."""
    inner = heads * dim_head
    M = bt * N
    f32, bf16 = 4, 2
    io = 2 * (2 * M * D * f32)                                   # x + out, 2x buffered
    wts = 2 * ((3 * D * inner + inner * D) * bf16 + 3 * D * f32)  # 2x buffered consts
    live = (M * D * (2 * f32 + bf16)                             # x, xn, xn_bf
            + M * 3 * inner * (f32 + bf16)                       # qkv f32 + q/k/v bf16
            + heads * bt * N * N * (2 * f32 + bf16)              # s, e, p
            + heads * bt * N * dim_head * f32                    # o3
            + M * inner * bf16 + M * D * f32)                    # o_cat, y
    return io + wts + live


def _pick_block_b(B, N, D, heads, dim_head, vmem_budget_bytes):
    """Largest divisor of B that fits the VMEM budget, capped at B//2 so the
    'parallel' batch grid axis has >= 2 steps (v7x has 2 TensorCores)."""
    cap = B if B == 1 else B // 2
    best = 1
    for bt in range(1, cap + 1):
        if B % bt != 0:
            continue
        if _tile_vmem_bytes(bt, N, D, heads, dim_head) <= vmem_budget_bytes:
            best = bt
    return best


def attention_forward(x, params, *, heads, dim_head, eps=1e-5, block_b=None):
    B, N, D = x.shape
    inner = heads * dim_head
    scale = dim_head ** -0.5

    vmem_budget = int(_vmem_capacity_bytes() * 3 // 4)   # leave headroom
    if block_b is None:
        block_b = _pick_block_b(B, N, D, heads, dim_head, vmem_budget)
    assert B % block_b == 0
    steps = B // block_b

    # Fused-projection weight layout (Q | K | V packed on the lane axis) and
    # bf16 MXU operands, assembled once in the wrapper (layout plumbing only).
    wqkv = jnp.concatenate([params["wq"], params["wkv"]], axis=1).astype(jnp.bfloat16)  # (D, 3*inner)
    wo = params["wo"].astype(jnp.bfloat16)                                              # (inner, D)
    gamma = params["gamma"].astype(jnp.float32).reshape(1, D)
    beta = params["beta"].astype(jnp.float32).reshape(1, D)
    bo = params["bo"].astype(jnp.float32).reshape(1, D)

    kernel = functools.partial(attention_kernel, heads=heads, dim_head=dim_head,
                               eps=eps, scale=scale)

    grid_spec = pltpu.PrefetchScalarGridSpec(
        num_scalar_prefetch=0,
        grid=(steps,),
        in_specs=[
            pl.BlockSpec((block_b, N, D), lambda b: (b, 0, 0)),    # x tile
            pl.BlockSpec((1, D), lambda b: (0, 0)),                # ln gamma
            pl.BlockSpec((1, D), lambda b: (0, 0)),                # ln beta
            pl.BlockSpec((D, 3 * inner), lambda b: (0, 0)),        # W_qkv fused
            pl.BlockSpec((inner, D), lambda b: (0, 0)),            # W_out fused
            pl.BlockSpec((1, D), lambda b: (0, 0)),                # b_out
        ],
        out_specs=pl.BlockSpec((block_b, N, D), lambda b: (b, 0, 0)),
    )

    # Advisory cost estimate; weights are streamed each grid step by default,
    # so charge them per-step.
    itemsize = x.dtype.itemsize
    flops = B * (2 * N * D * 3 * inner               # fused QKV projection
                 + 4 * heads * N * N * dim_head      # QK^T and attn @ V
                 + 2 * N * inner * D)                # fused output projection
    transcendentals = B * heads * N * N + B * N + B * heads * N
    bytes_accessed = (2 * x.size * itemsize
                      + steps * (wqkv.size + wo.size) * 2
                      + steps * (gamma.size + beta.size + bo.size) * 4)

    # TODO(synk): for large N switch to a flash-attention structure (online
    #             softmax over kv tiles); threshold ~2x lower on v7x (64 MiB
    #             VMEM) than on v5e/v6e (128 MiB).
    # TODO(synk): constant-index weight inputs could be single-buffered
    #             (pipeline_mode=pl.Buffered(1)) to halve their VMEM; skipped
    #             here because the weights are tiny at these shapes.
    # TODO(synk): a lane-dense (block_b, N*D) output slab would avoid masked
    #             stores for D < 128, but costs an in-kernel lane re-pack
    #             relayout that does not pay off at these small shapes.
    return pl.pallas_call(
        kernel,
        out_shape=jax.ShapeDtypeStruct((B, N, D), x.dtype),
        grid_spec=grid_spec,
        compiler_params=pltpu.CompilerParams(
            dimension_semantics=("parallel",),
            vmem_limit_bytes=vmem_budget,
        ),
        cost_estimate=pl.CostEstimate(flops=flops,
                                      transcendentals=transcendentals,
                                      bytes_accessed=bytes_accessed),
    )(x, gamma, beta, wqkv, wo, bo)


def reference_forward(x, params, *, heads, dim_head, eps=1e-5):
    """Pure-JAX f32 reference mirroring the PyTorch forward."""
    B, N, D = x.shape
    inner = heads * dim_head
    mean = jnp.mean(x, axis=-1, keepdims=True)
    var = jnp.mean((x - mean) ** 2, axis=-1, keepdims=True)
    xn = (x - mean) / jnp.sqrt(var + eps) * params["gamma"] + params["beta"]
    q = xn @ params["wq"]
    kv = xn @ params["wkv"]
    k, v = kv[..., :inner], kv[..., inner:]

    def split_heads(t):
        return t.reshape(B, N, heads, dim_head).transpose(0, 2, 1, 3)

    q, k, v = map(split_heads, (q, k, v))
    dots = jnp.einsum("bhid,bhjd->bhij", q, k) * (dim_head ** -0.5)
    attn = jax.nn.softmax(dots, axis=-1)
    out = jnp.einsum("bhij,bhjd->bhid", attn, v)
    out = out.transpose(0, 2, 1, 3).reshape(B, N, inner)
    return out @ params["wo"] + params["bo"]


if __name__ == "__main__":
    # Shapes consistent with the module: dim=32, heads=4, dim_head=16.
    B, N, D = 2, 8, 32
    heads, dim_head = 4, 16
    inner = heads * dim_head

    key = jax.random.PRNGKey(0)
    kx, kq, kkv, ko, kb, kg, kbt = jax.random.split(key, 7)

    x = jax.random.normal(kx, (B, N, D), dtype=jnp.float32)
    params = {
        "gamma": 1.0 + 0.1 * jax.random.normal(kg, (1, D), jnp.float32),
        "beta": 0.1 * jax.random.normal(kbt, (1, D), jnp.float32),
        "wq": jax.random.normal(kq, (D, inner), jnp.float32) * (D ** -0.5),
        "wkv": jax.random.normal(kkv, (D, 2 * inner), jnp.float32) * (D ** -0.5),
        "wo": jax.random.normal(ko, (inner, D), jnp.float32) * (inner ** -0.5),
        "bo": jax.random.normal(kb, (1, D), jnp.float32) * 0.01,
    }

    out = attention_forward(x, params, heads=heads, dim_head=dim_head)
    out = jax.block_until_ready(out)

    ref = reference_forward(x, params, heads=heads, dim_head=dim_head)
    # bf16 MXU operands (f32 accumulation, f32 LN/softmax stats) -> relaxed
    # tolerance versus the all-f32 reference.
    assert jnp.allclose(out, ref, atol=3e-2, rtol=3e-2), "mismatch vs reference"

    print("KERNEL_OK")
</pallas_src>

<mosaic_0001>
module attributes {stable_mosaic.version = 11 : i64} {
  func.func @attention_kernel(%arg0: i32, %arg1: memref<1x8x32xf32, #tpu.memory_space<vmem>>, %arg2: memref<1x32xf32, #tpu.memory_space<vmem>>, %arg3: memref<1x32xf32, #tpu.memory_space<vmem>>, %arg4: memref<32x192xbf16, #tpu.memory_space<vmem>>, %arg5: memref<64x32xbf16, #tpu.memory_space<vmem>>, %arg6: memref<1x32xf32, #tpu.memory_space<vmem>>, %arg7: memref<1x8x32xf32, #tpu.memory_space<vmem>>) attributes {dimension_semantics = [#tpu.dimension_semantics<parallel>], iteration_bounds = array<i64: 2>, scalar_prefetch = 0 : i64, scratch_operands = 0 : i64, tpu.core_type = #tpu.core_type<tc>, window_params = [{transform_indices = @transform_0, window_bounds = array<i64: 1, 8, 32>}, {pipeline_mode = #tpu.pipeline_mode<synchronous>, transform_indices = @transform_1, window_bounds = array<i64: 1, 32>}, {pipeline_mode = #tpu.pipeline_mode<synchronous>, transform_indices = @transform_2, window_bounds = array<i64: 1, 32>}, {pipeline_mode = #tpu.pipeline_mode<synchronous>, transform_indices = @transform_3, window_bounds = array<i64: 32, 192>}, {pipeline_mode = #tpu.pipeline_mode<synchronous>, transform_indices = @transform_4, window_bounds = array<i64: 64, 32>}, {pipeline_mode = #tpu.pipeline_mode<synchronous>, transform_indices = @transform_5, window_bounds = array<i64: 1, 32>}, {transform_indices = @transform_6, window_bounds = array<i64: 1, 8, 32>}]} {
    %c0 = arith.constant 0 : index
    %c0_0 = arith.constant 0 : index
    %c0_1 = arith.constant 0 : index
    %0 = vector.load %arg1[%c0, %c0_0, %c0_1] : memref<1x8x32xf32, #tpu.memory_space<vmem>>, vector<1x8x32xf32>
    %1 = vector.shape_cast %0 : vector<1x8x32xf32> to vector<8x32xf32>
    %cst = arith.constant dense<0.000000e+00> : vector<8xf32>
    %2 = vector.multi_reduction <add>, %1, %cst [1] : vector<8x32xf32> to vector<8xf32>
    %3 = vector.shape_cast %2 : vector<8xf32> to vector<8x1xf32>
    %cst_2 = arith.constant 3.200000e+01 : f32
    %4 = vector.broadcast %cst_2 : f32 to vector<8x1xf32>
    %5 = arith.divf %3, %4 : vector<8x1xf32>
    %6 = vector.broadcast %5 : vector<8x1xf32> to vector<8x32xf32>
    %7 = arith.subf %1, %6 : vector<8x32xf32>
    %8 = arith.mulf %7, %7 : vector<8x32xf32>
    %cst_3 = arith.constant dense<0.000000e+00> : vector<8xf32>
    %9 = vector.multi_reduction <add>, %8, %cst_3 [1] : vector<8x32xf32> to vector<8xf32>
    %10 = vector.shape_cast %9 : vector<8xf32> to vector<8x1xf32>
    %cst_4 = arith.constant 3.200000e+01 : f32
    %11 = vector.broadcast %cst_4 : f32 to vector<8x1xf32>
    %12 = arith.divf %10, %11 : vector<8x1xf32>
    %cst_5 = arith.constant 9.99999974E-6 : f32
    %13 = vector.broadcast %cst_5 : f32 to vector<8x1xf32>
    %14 = arith.addf %12, %13 : vector<8x1xf32>
    %15 = math.rsqrt %14 : vector<8x1xf32>
    %16 = vector.broadcast %15 : vector<8x1xf32> to vector<8x32xf32>
    %17 = arith.mulf %7, %16 : vector<8x32xf32>
    %c0_6 = arith.constant 0 : index
    %c0_7 = arith.constant 0 : index
    %18 = vector.load %arg2[%c0_6, %c0_7] : memref<1x32xf32, #tpu.memory_space<vmem>>, vector<1x32xf32>
    %19 = vector.broadcast %18 : vector<1x32xf32> to vector<8x32xf32>
    %20 = arith.mulf %17, %19 : vector<8x32xf32>
    %c0_8 = arith.constant 0 : index
    %c0_9 = arith.constant 0 : index
    %21 = vector.load %arg3[%c0_8, %c0_9] : memref<1x32xf32, #tpu.memory_space<vmem>>, vector<1x32xf32>
    %22 = vector.broadcast %21 : vector<1x32xf32> to vector<8x32xf32>
    %23 = arith.addf %20, %22 : vector<8x32xf32>
    %24 = arith.truncf %23 : vector<8x32xf32> to vector<8x32xbf16>
    %c0_10 = arith.constant 0 : index
    %c0_11 = arith.constant 0 : index
    %25 = vector.load %arg4[%c0_10, %c0_11] : memref<32x192xbf16, #tpu.memory_space<vmem>>, vector<32x192xbf16>
    %cst_12 = arith.constant dense<0.000000e+00> : vector<8x192xf32>
    %26 = tpu.matmul %24, %25, %cst_12 {dimension_numbers = #tpu.dot_dimension_numbers<[1], [0], [0], [1], [0, 0, 1, 1], [], []>} : vector<8x32xbf16>, vector<32x192xbf16>, vector<8x192xf32> -> vector<8x192xf32>
    %27 = vector.extract_strided_slice %26 {offsets = [0, 0], sizes = [8, 64], strides = [1, 1]} : vector<8x192xf32> to vector<8x64xf32>
    %cst_13 = arith.constant 2.500000e-01 : f32
    %28 = vector.broadcast %cst_13 : f32 to vector<8x64xf32>
    %29 = arith.mulf %27, %28 : vector<8x64xf32>
    %30 = vector.extract_strided_slice %29 {offsets = [0, 0], sizes = [8, 16], strides = [1, 1]} : vector<8x64xf32> to vector<8x16xf32>
    %31 = vector.shape_cast %30 : vector<8x16xf32> to vector<1x8x16xf32>
    %32 = vector.extract_strided_slice %29 {offsets = [0, 16], sizes = [8, 16], strides = [1, 1]} : vector<8x64xf32> to vector<8x16xf32>
    %33 = vector.shape_cast %32 : vector<8x16xf32> to vector<1x8x16xf32>
    %34 = vector.extract_strided_slice %29 {offsets = [0, 32], sizes = [8, 16], strides = [1, 1]} : vector<8x64xf32> to vector<8x16xf32>
    %35 = vector.shape_cast %34 : vector<8x16xf32> to vector<1x8x16xf32>
    %36 = vector.extract_strided_slice %29 {offsets = [0, 48], sizes = [8, 16], strides = [1, 1]} : vector<8x64xf32> to vector<8x16xf32>
    %37 = vector.shape_cast %36 : vector<8x16xf32> to vector<1x8x16xf32>
    %38 = tpu.concatenate %31, %33, %35, %37 in 0 : vector<1x8x16xf32>, vector<1x8x16xf32>, vector<1x8x16xf32>, vector<1x8x16xf32> -> vector<4x8x16xf32>
    %39 = arith.truncf %38 : vector<4x8x16xf32> to vector<4x8x16xbf16>
    %40 = vector.extract_strided_slice %26 {offsets = [0, 64], sizes = [8, 64], strides = [1, 1]} : vector<8x192xf32> to vector<8x64xf32>
    %41 = vector.extract_strided_slice %40 {offsets = [0, 0], sizes = [8, 16], strides = [1, 1]} : vector<8x64xf32> to vector<8x16xf32>
    %42 = vector.shape_cast %41 : vector<8x16xf32> to vector<1x8x16xf32>
    %43 = vector.extract_strided_slice %40 {offsets = [0, 16], sizes = [8, 16], strides = [1, 1]} : vector<8x64xf32> to vector<8x16xf32>
    %44 = vector.shape_cast %43 : vector<8x16xf32> to vector<1x8x16xf32>
    %45 = vector.extract_strided_slice %40 {offsets = [0, 32], sizes = [8, 16], strides = [1, 1]} : vector<8x64xf32> to vector<8x16xf32>
    %46 = vector.shape_cast %45 : vector<8x16xf32> to vector<1x8x16xf32>
    %47 = vector.extract_strided_slice %40 {offsets = [0, 48], sizes = [8, 16], strides = [1, 1]} : vector<8x64xf32> to vector<8x16xf32>
    %48 = vector.shape_cast %47 : vector<8x16xf32> to vector<1x8x16xf32>
    %49 = tpu.concatenate %42, %44, %46, %48 in 0 : vector<1x8x16xf32>, vector<1x8x16xf32>, vector<1x8x16xf32>, vector<1x8x16xf32> -> vector<4x8x16xf32>
    %50 = arith.truncf %49 : vector<4x8x16xf32> to vector<4x8x16xbf16>
    %51 = vector.extract_strided_slice %26 {offsets = [0, 128], sizes = [8, 64], strides = [1, 1]} : vector<8x192xf32> to vector<8x64xf32>
    %52 = vector.extract_strided_slice %51 {offsets = [0, 0], sizes = [8, 16], strides = [1, 1]} : vector<8x64xf32> to vector<8x16xf32>
    %53 = vector.shape_cast %52 : vector<8x16xf32> to vector<1x8x16xf32>
    %54 = vector.extract_strided_slice %51 {offsets = [0, 16], sizes = [8, 16], strides = [1, 1]} : vector<8x64xf32> to vector<8x16xf32>
    %55 = vector.shape_cast %54 : vector<8x16xf32> to vector<1x8x16xf32>
    %56 = vector.extract_strided_slice %51 {offsets = [0, 32], sizes = [8, 16], strides = [1, 1]} : vector<8x64xf32> to vector<8x16xf32>
    %57 = vector.shape_cast %56 : vector<8x16xf32> to vector<1x8x16xf32>
    %58 = vector.extract_strided_slice %51 {offsets = [0, 48], sizes = [8, 16], strides = [1, 1]} : vector<8x64xf32> to vector<8x16xf32>
    %59 = vector.shape_cast %58 : vector<8x16xf32> to vector<1x8x16xf32>
    %60 = tpu.concatenate %53, %55, %57, %59 in 0 : vector<1x8x16xf32>, vector<1x8x16xf32>, vector<1x8x16xf32>, vector<1x8x16xf32> -> vector<4x8x16xf32>
    %61 = arith.truncf %60 : vector<4x8x16xf32> to vector<4x8x16xbf16>
    "tpu.trace_start"() <{level = 10 : i32, message = "bqd,bkd->bqk"}> : () -> ()
    %cst_14 = arith.constant dense<0.000000e+00> : vector<4x8x8xf32>
    %62 = tpu.matmul %39, %50, %cst_14 {dimension_numbers = #tpu.dot_dimension_numbers<[2], [2], [1], [1], [0, 0, 0, 1, 1, 1], [0], [0]>} : vector<4x8x16xbf16>, vector<4x8x16xbf16>, vector<4x8x8xf32> -> vector<4x8x8xf32>
    "tpu.trace_stop"() : () -> ()
    %cst_15 = arith.constant dense<0xFF800000> : vector<4x8xf32>
    %63 = vector.multi_reduction <maximumf>, %62, %cst_15 [2] : vector<4x8x8xf32> to vector<4x8xf32>
    %64 = vector.shape_cast %63 : vector<4x8xf32> to vector<4x8x1xf32>
    %65 = vector.broadcast %64 : vector<4x8x1xf32> to vector<4x8x8xf32>
    %66 = arith.subf %62, %65 : vector<4x8x8xf32>
    %67 = math.exp %66 : vector<4x8x8xf32>
    %cst_16 = arith.constant dense<0.000000e+00> : vector<4x8xf32>
    %68 = vector.multi_reduction <add>, %67, %cst_16 [2] : vector<4x8x8xf32> to vector<4x8xf32>
    %69 = vector.shape_cast %68 : vector<4x8xf32> to vector<4x8x1xf32>
    %70 = tpu.reciprocal %69 {approx = true} : vector<4x8x1xf32> -> vector<4x8x1xf32>
    %71 = vector.broadcast %70 : vector<4x8x1xf32> to vector<4x8x8xf32>
    %72 = arith.mulf %67, %71 : vector<4x8x8xf32>
    %73 = arith.truncf %72 : vector<4x8x8xf32> to vector<4x8x8xbf16>
    "tpu.trace_start"() <{level = 10 : i32, message = "bqk,bkd->bqd"}> : () -> ()
    %cst_17 = arith.constant dense<0.000000e+00> : vector<4x8x16xf32>
    %74 = tpu.matmul %73, %61, %cst_17 {dimension_numbers = #tpu.dot_dimension_numbers<[2], [1], [1], [2], [0, 0, 0, 1, 1, 2], [0], [0]>} : vector<4x8x8xbf16>, vector<4x8x16xbf16>, vector<4x8x16xf32> -> vector<4x8x16xf32>
    "tpu.trace_stop"() : () -> ()
    %75 = vector.extract_strided_slice %74 {offsets = [0, 0, 0], sizes = [1, 8, 16], strides = [1, 1, 1]} : vector<4x8x16xf32> to vector<1x8x16xf32>
    %76 = vector.shape_cast %75 : vector<1x8x16xf32> to vector<8x16xf32>
    %77 = vector.extract_strided_slice %74 {offsets = [1, 0, 0], sizes = [1, 8, 16], strides = [1, 1, 1]} : vector<4x8x16xf32> to vector<1x8x16xf32>
    %78 = vector.shape_cast %77 : vector<1x8x16xf32> to vector<8x16xf32>
    %79 = vector.extract_strided_slice %74 {offsets = [2, 0, 0], sizes = [1, 8, 16], strides = [1, 1, 1]} : vector<4x8x16xf32> to vector<1x8x16xf32>
    %80 = vector.shape_cast %79 : vector<1x8x16xf32> to vector<8x16xf32>
    %81 = vector.extract_strided_slice %74 {offsets = [3, 0, 0], sizes = [1, 8, 16], strides = [1, 1, 1]} : vector<4x8x16xf32> to vector<1x8x16xf32>
    %82 = vector.shape_cast %81 : vector<1x8x16xf32> to vector<8x16xf32>
    %83 = tpu.concatenate %76, %78, %80, %82 in 1 : vector<8x16xf32>, vector<8x16xf32>, vector<8x16xf32>, vector<8x16xf32> -> vector<8x64xf32>
    %84 = arith.truncf %83 : vector<8x64xf32> to vector<8x64xbf16>
    %c0_18 = arith.constant 0 : index
    %c0_19 = arith.constant 0 : index
    %85 = vector.load %arg5[%c0_18, %c0_19] : memref<64x32xbf16, #tpu.memory_space<vmem>>, vector<64x32xbf16>
    %cst_20 = arith.constant dense<0.000000e+00> : vector<8x32xf32>
    %86 = tpu.matmul %84, %85, %cst_20 {dimension_numbers = #tpu.dot_dimension_numbers<[1], [0], [0], [1], [0, 0, 1, 1], [], []>} : vector<8x64xbf16>, vector<64x32xbf16>, vector<8x32xf32> -> vector<8x32xf32>
    %c0_21 = arith.constant 0 : index
    %c0_22 = arith.constant 0 : index
    %87 = vector.load %arg6[%c0_21, %c0_22] : memref<1x32xf32, #tpu.memory_space<vmem>>, vector<1x32xf32>
    %88 = vector.broadcast %87 : vector<1x32xf32> to vector<8x32xf32>
    %89 = arith.addf %86, %88 : vector<8x32xf32>
    %90 = vector.shape_cast %89 : vector<8x32xf32> to vector<1x8x32xf32>
    %c0_23 = arith.constant 0 : index
    %c0_24 = arith.constant 0 : index
    %c0_25 = arith.constant 0 : index
    %91 = vector.load %arg7[%c0_23, %c0_24, %c0_25] : memref<1x8x32xf32, #tpu.memory_space<vmem>>, vector<1x8x32xf32>
    tpu.vector_store %arg7[%c0_23, %c0_24, %c0_25], %90 {strides = array<i32>} : memref<1x8x32xf32, #tpu.memory_space<vmem>>, vector<1x8x32xf32>,
    return
  }
  func.func @transform_0(%arg0: i32) -> (i32, i32, i32) {
    %c0_i32 = arith.constant 0 : i32
    %c0_i32_0 = arith.constant 0 : i32
    %c0_i32_1 = arith.constant 0 : i32
    return %arg0, %c0_i32, %c0_i32_0 : i32, i32, i32
  }
  func.func @transform_1(%arg0: i32) -> (i32, i32) {
    %c0_i32 = arith.constant 0 : i32
    %c0_i32_0 = arith.constant 0 : i32
    %c0_i32_1 = arith.constant 0 : i32
    return %c0_i32, %c0_i32_0 : i32, i32
  }
  func.func @transform_2(%arg0: i32) -> (i32, i32) {
    %c0_i32 = arith.constant 0 : i32
    %c0_i32_0 = arith.constant 0 : i32
    %c0_i32_1 = arith.constant 0 : i32
    return %c0_i32, %c0_i32_0 : i32, i32
  }
  func.func @transform_3(%arg0: i32) -> (i32, i32) {
    %c0_i32 = arith.constant 0 : i32
    %c0_i32_0 = arith.constant 0 : i32
    %c0_i32_1 = arith.constant 0 : i32
    return %c0_i32, %c0_i32_0 : i32, i32
  }
  func.func @transform_4(%arg0: i32) -> (i32, i32) {
    %c0_i32 = arith.constant 0 : i32
    %c0_i32_0 = arith.constant 0 : i32
    %c0_i32_1 = arith.constant 0 : i32
    return %c0_i32, %c0_i32_0 : i32, i32
  }
  func.func @transform_5(%arg0: i32) -> (i32, i32) {
    %c0_i32 = arith.constant 0 : i32
    %c0_i32_0 = arith.constant 0 : i32
    %c0_i32_1 = arith.constant 0 : i32
    return %c0_i32, %c0_i32_0 : i32, i32
  }
  func.func @transform_6(%arg0: i32) -> (i32, i32, i32) {
    %c0_i32 = arith.constant 0 : i32
    %c0_i32_0 = arith.constant 0 : i32
    %c0_i32_1 = arith.constant 0 : i32
    return %arg0, %c0_i32, %c0_i32_0 : i32, i32, i32
  }
}

</mosaic_0001>

<bundles_post_ra>
// kernel: tpu_custom_call.1
= control target key start
LH: loop header
LB: loop body
LE: loop exit
PB: predicated region body
PF: predicated region fallthrough
CT: control target
= control target key end

     0   :  { %11 = vsyncpa [#allocation3], 0  ;;  %s1170_s0 = inlined_call_operand.vmem [shape: f32[2,8,32], index: 0, kind: input, shape index: {}]   ;;  %s1171_s1 = inlined_call_operand.vmem [shape: f32[1,32], index: 1, kind: input, shape index: {}]   ;;  %s1172_s2 = inlined_call_operand.vmem [shape: f32[1,32], index: 2, kind: input, shape index: {}]   ;;  %s1173_s3 = inlined_call_operand.vmem [shape: bf16[32,192], index: 3, kind: input, shape index: {}]   ;;  %s1174_s4 = inlined_call_operand.vmem [shape: bf16[64,32], index: 4, kind: input, shape index: {}]   ;;  %s1175_s5 = inlined_call_operand.vmem [shape: f32[1,32], index: 5, kind: input, shape index: {}]   ;;  %s1176_s6 = inlined_call_operand.hbm [shape: f32[2,8,32], index: 6, kind: output, shape index: {}]  }
   0x1   :  { %13 = vsyncpa [#allocation3 + $0x1], 0  ;;  %s993_s21 = smov 0   ;;  %s995_s22 = smov 0  }
   0x2   :  { %s997_s23 = smov 0   ;;  %s999_s24 = smov 0  }
   0x3 LB: > { %s1014_s25 = sadd.s32 4294967295, %s948_s24   ;;  %s755_s26 = sadd.s32 4294967294, %s948_s24   ;;  %s948_s24 = sphi %s999_s24, %s1182_s24   ;;  %s944_s23 = sphi %s997_s23, %s1181_s23   ;;  %s940_s22 = sphi %s995_s22, %s1180_s22   ;;  %s936_s21 = sphi %s993_s21, %s1179_s21  }
   0x4   : > { %s1018_s27 = sadd.s32 1, %s948_s24   ;;  %s157_s28 = sadd.s32 1, %s944_s23 }
   0x5   : > { %s154_s29 = ssub.s32 %s948_s24, %s1018_s27  ;;  %p167_p0 = scmp.ne.s32.totalorder %s944_s23, %s940_s22 }
   0x6   : > { %p155_p1 = scmp.eq.s32.totalorder %s154_s29, 0  ;;  %p168_p2 = scmp.eq.s32.totalorder %s1014_s25, 1 }
   0x7   : > { %p173_p3 = scmp.ne.s32.totalorder %s940_s22, %s936_s21  ;;  %p174_p4 = scmp.eq.s32.totalorder %s755_s26, 1 }
   0x8   : > { %s1029_s30 = scalar_select %p155_p1, %s944_s23, %s157_s28  }
   0x9   : > { %p1031_p5 = por %p168_p2, %p167_p0  ;;  %p1035_p6 = por %p174_p4, %p173_p3 }
   0xa   : > { %p758_p7 = scmp.ge.s32.totalorder %s948_s24, 1  ;;  %p214_p8 = scmp.lt.s32.totalorder %s948_s24, 3 }
   0xc   : > { %p215_p9 = pnand %p758_p7, %p214_p8 }
   0xd   : > { %p243_p10 = scmp.lt.s32.totalorder (!%p215_p9), %s1014_s25, 1  ;;  %s951_s19 = smov (!%p215_p9), 80  }
   0xe   : > { %218 = sbr.rel (%p215_p9) target bundleno = 1460 (0x5b4), region = 44  ;;  %s952_s20 = smov (!%p215_p9), 112  }
   0xf   : > { %s953_s26 = smov (!%p215_p9), 96   ;;  %s954_s28 = smov (!%p215_p9), 64  }
  0x10   : > { %s955_s29 = smov (!%p215_p9), 16  }
  0x13   : > { %s244_s9 = scalar_select %p243_p10, %s1014_s25, 1  ;;  %vm249_vm0 = vcmask 261120   ;;  %v950_v2 = vmov 32.0   ;;  %v771_v14 = vld [vmem:[%s1173_s3 + $0x10] sm:$0xf]  ;;  %vm391_vm5 = vcmask 130048  }
  0x14   : > { %866 = vrcp.f32 %v950_v2  ;;  %v811_v15 = vld [vmem:[%s1173_s3 + $0x14] sm:$0xf0]  ;;  %v810_v16 = vld [vmem:[%s1173_s3 + $0x14] sm:$0xf]  ;;  %v773_v18 = vld [vmem:[%s1173_s3 + $0x18] sm:$0xf0] }
  0x15   : > { %s760_s10 = sshll.u32 %s244_s9, 3  ;;  %v772_v17 = vor.u32 %v811_v15, %v771_v14  ;;  %v763_v19 = vld [vmem:[%s1173_s3] sm:$0xf]  ;;  %v809_v20 = vld [vmem:[%s1173_s3 + $0x4] sm:$0xf0]  ;;  %v776_v21 = vor.u32 %v810_v16, %v773_v18  ;;  %vm535_vm6 = vcmask 1043456  }
  0x16   : > { %s246_s13 = scalar_lea.vmem %s1170_s0, %s760_s10  ;;  %v808_v22 = vld [vmem:[%s1173_s3 + $0x4] sm:$0xf]  ;;  %v765_v23 = vld [vmem:[%s1173_s3 + $0x8] sm:$0xf0]  ;;  %v764_v24 = vor.u32 %v809_v20, %v763_v19  ;;  %v863_v35 = vld [vmem:[%s1171_s1] ss:$0 sm:$0xff] }
  0x17   : > { %v248_v0 = vld [vmem:[%s246_s13] sm:$0xff]  ;;  %323 = vmatpush.bf16.msra.mxu0 %v772_v17  ;;  %336 = vmatpush.bf16.msra.mxu1 %v776_v21  ;;  %v768_v25 = vor.u32 %v808_v22, %v765_v23  ;;  %vm483_vm7 = vcmask 64512   ;;  %s956_s9 = smov 48   ;;  %s957_s10 = smov 32   ;;  %vm623_vm8 = vcmask 392192   ;;  %vm662_vm9 = vcmask 523264  }
  0x18   : > { %v250_v1 = vsel %vm249_vm0, %v248_v0, 0.0  ;;  %v864_v38 = vld [vmem:[%s1172_s2] ss:$0 sm:$0xff] }
  0x19   : > { %251 = vadd.xlane.f32.xlu0 %v250_v1 }
  0x1a   : > { %v867_v3 = vpop.eup %866 }
  0x1b   : > { %v254_v4 = vmul.f32 32.0, %v867_v3  ;;  %vm258_vm1 = vweird.f32 %v867_v3  ;;  %324 = vmatpush.bf16.msra.mxu0 %v764_v24  ;;  %337 = vmatpush.bf16.msra.mxu1 %v768_v25 }
  0x1d   : > { %v255_v5 = vsub.f32 1.0, %v254_v4 }
  0x1f   : > { %v256_v6 = vmul.f32 %v867_v3, %v255_v5 }
  0x21   : > { %v257_v7 = vadd.f32 %v867_v3, %v256_v6 }
  0x23   : > { %v259_v8 = vsel %vm258_vm1, %v867_v3, %v257_v7 }
  0x8c   : > { %v252_v9 = vpop.xlane.xlu0 %251 }
  0x8d   : > { %v260_v10 = vmul.f32 %v259_v8, %v252_v9 }
  0x8f   : > { %v261_v11 = vsub.f32 %v248_v0, %v260_v10 }
  0x91   : > { %v262_v12 = vmul.f32 %v261_v11, %v261_v11 }
  0x93   : > { %v263_v13 = vsel %vm249_vm0, %v262_v12, 0.0 }
  0x94   : > { %264 = vadd.xlane.f32.xlu0 %v263_v13 }
 0x107   : > { %v265_v26 = vpop.xlane.xlu0 %264 }
 0x108   : > { %v266_v27 = vmul.f32 %v265_v26, %v259_v8 }
 0x10a   : > { %v267_v28 = vadd.f32 1e-05, %v266_v27 }
 0x10c   : > { %868 = vrsqrt.f32 %v267_v28  ;;  %vm274_vm3 = vweird.f32 %v267_v28 }
 0x112   : > { %v869_v29 = vpop.eup %868 }
 0x113   : > { %v269_v30 = vmul.f32 %v869_v29, %v267_v28  ;;  %vm275_vm2 = vweird.f32 %v869_v29 }
 0x114   : > { %vm276_vm4 = vmor %vm274_vm3, %vm275_vm2 }
 0x115   : > { %v270_v31 = vmul.f32 %v869_v29, %v269_v30 }
 0x117   : > { %v271_v32 = vmul.f32 0.5, %v270_v31 }
 0x119   : > { %v272_v33 = vsub.f32 1.5, %v271_v32 }
 0x11b   : > { %v273_v34 = vmul.f32 %v869_v29, %v272_v33 }
 0x11d   : > { %v277_v36 = vsel %vm276_vm4, %v869_v29, %v273_v34 }
 0x11e   : > { %v278_v37 = vmul.f32 %v277_v36, %v261_v11 }
 0x120   : > { %v283_v39 = vmul.f32 %v863_v35, %v278_v37 }
 0x122   : > { %v288_v40 = vadd.f32 %v864_v38, %v283_v39 }
 0x124   : > { %v289_v41 = vpack.c.bf16 %v288_v40, %v288_v40 }
 0x126   : > { %777 = vmatmul.msk.bf16.vlgmr.msra.gmra.mxu0 %vm249_vm0, %v289_v41  ;;  %778 = vmatmul.msk.bf16.vlgmr.msra.gmra.mxu1 %vm249_vm0, %v289_v41 }
 0x1a3   : > { %v326_v42 = vpop.f32.mrf.mxu0  ;;  %v1080_v43 = vpop.f32.mrf.mxu1 }
 0x1a4   : > { %365 = vrot.lane.b32.xlu2 %v326_v42, %s951_s19  ;;  %359 = vrot.lane.b32.xlu1 %v326_v42, %s952_s20  ;;  %v343_v44 = vmul.f32 0.25, %v326_v42  ;;  %v368_v59 = vpack.c.bf16 %v326_v42, %v326_v42  ;;  %v382_v10 = vpack.c.bf16 %v1080_v43, %v1080_v43 }
 0x1a6   : > { %345 = vrot.lane.b32.xlu0 %v343_v44, %s952_s20  ;;  %v387_v60 = vunpack.c.l.b16 %v368_v59  ;;  %v537_v13 = vsel %vm535_vm6, %v382_v10, 0  ;;  %v354_v14 = vpack.c.bf16 %v343_v44, %v343_v44 }
 0x1a8   : > { %v388_v61 = vpack.c.b16 %v387_v60, %v387_v60 }
 0x1ab   : > { %v328_v45 = vpop.f32.mrf.mxu0  ;;  %v341_v46 = vpop.f32.mrf.mxu1 }
 0x1ac   : > { %362 = vrot.lane.b32.xlu1 %v326_v42, %s953_s26 }
 0x1fe   : > { %v366_v49 = vpop.permute.xlu2 %365 }
 0x1ff   : > { %v371_v51 = vpack.c.bf16 %v366_v49, %v366_v49 }
 0x201   : > { %v460_v54 = vunpack.c.l.b16 %v371_v51 }
 0x203   : > { %v461_v57 = vpack.c.b16 %v460_v54, %v460_v54 }
 0x216   : > { %v360_v47 = vpop.permute.xlu1 %359 }
 0x217   : > { %v369_v48 = vpack.c.bf16 %v360_v47, %v360_v47 }
 0x218   : > { %v346_v0 = vpop.permute.xlu0 %345 }
 0x219   : > { %v412_v50 = vunpack.c.l.b16 %v369_v48  ;;  %v355_v1 = vpack.c.bf16 %v346_v0, %v346_v0 }
 0x21b   : > { %v413_v52 = vpack.c.b16 %v412_v50, %v412_v50 }
 0x21d   : > { %414 = vrot.lane.b32.xlu2 %v413_v52, %s954_s28 }
 0x21e   : > { %v363_v53 = vpop.permute.xlu1 %362 }
 0x21f   : > { %v370_v55 = vpack.c.bf16 %v363_v53, %v363_v53 }
 0x221   : > { %v436_v56 = vunpack.c.l.b16 %v370_v55 }
 0x223   : > { %v437_v58 = vpack.c.b16 %v436_v56, %v436_v56 }
 0x225   : > { %462 = vrot.lane.b32.xlu2 %v461_v57, %s954_s28  ;;  %438 = vrot.lane.b32.xlu1 %v437_v58, %s954_s28 }
 0x22d   : > { %351 = vrot.lane.b32.xlu2 %v343_v44, %s951_s19  ;;  %348 = vrot.lane.b32.xlu1 %v343_v44, %s953_s26 }
 0x235   : > { %389 = vrot.lane.b32.xlu1 %v388_v61, %s954_s28 }
 0x277   : > { %v415_v62 = vpop.permute.xlu2 %414 }
 0x278   : > { %v420_v63 = vsel %vm391_vm5, %v415_v62, 0 }
 0x279   : > { %429 = vmatpush.bf16.xpose.msra.mxu3 %v420_v63 }
 0x27f   : > { %v463_v2 = vpop.permute.xlu2 %462 }
 0x280   : > { %780 = vmatmul.msk.bf16.vlgmr.msra.gmra.mxu3 %vm391_vm5, %v355_v1  ;;  %v468_v3 = vsel %vm391_vm5, %v463_v2, 0 }
 0x281   : > { %477 = vmatpush.bf16.xpose.msrb.mxu1 %v468_v3 }
 0x287   : > { %v352_v4 = vpop.permute.xlu2 %351 }
 0x288   : > { %v357_v5 = vpack.c.bf16 %v352_v4, %v352_v4 }
 0x28a   : > { %782 = vmatmul.msk.bf16.vlgmr.msrb.gmra.mxu1 %vm391_vm5, %v357_v5 }
 0x297   : > { %v439_v6 = vpop.permute.xlu1 %438 }
 0x298   : > { %v444_v7 = vsel %vm391_vm5, %v439_v6, 0 }
 0x299   : > { %453 = vmatpush.bf16.xpose.msrb.mxu0 %v444_v7 }
 0x29f   : > { %v349_v8 = vpop.permute.xlu1 %348 }
 0x2a0   : > { %v356_v9 = vpack.c.bf16 %v349_v8, %v349_v8 }
 0x2a2   : > { %781 = vmatmul.msk.bf16.vlgmr.msrb.gmra.mxu0 %vm391_vm5, %v356_v9 }
 0x2a7   : > { %v390_v11 = vpop.permute.xlu1 %389 }
 0x2a8   : > { %v396_v12 = vsel %vm391_vm5, %v390_v11, 0 }
 0x2a9   : > { %405 = vmatpush.bf16.xpose.msra.mxu2 %v396_v12 }
 0x2b0   : > { %779 = vmatmul.msk.bf16.vlgmr.msra.gmra.mxu2 %vm391_vm5, %v354_v14 }
 0x2b1   : > { %546 = vmatpush.bf16.msrb.mxu2 %v537_v13 }
 0x303   : > { %v431_v15 = vpop.f32.mrf.mxu3 }
 0x304   : > { %v487_v16 = vsel %vm483_vm7, %v431_v15, -inf }
 0x305   : > { %488 = vmax.xlane.f32.xlu2 %v487_v16  ;;  %v815_v16 = vld [vmem:[%s1174_s4 + $0x18] sm:$0xff] }
 0x306   : > { %670 = vmatpush.bf16.msra.mxu2 %v815_v16 }
 0x307   : > { %v479_v17 = vpop.f32.mrf.mxu1 }
 0x308   : > { %v493_v18 = vsel %vm483_vm7, %v479_v17, -inf }
 0x309   : > { %494 = vmax.xlane.f32.xlu1 %v493_v18  ;;  %v813_v18 = vld [vmem:[%s1174_s4 + $0x8] sm:$0xff] }
 0x30b   : > { %v433_v19 = vpop.f32.mrf.mxu3 }
 0x30c   : > { %v812_v19 = vld [vmem:[%s1174_s4] sm:$0xff] }
 0x30f   : > { %v481_v20 = vpop.f32.mrf.mxu1 }
 0x31f   : > { %v455_v21 = vpop.f32.mrf.mxu0 }
 0x320   : > { %v490_v22 = vsel %vm483_vm7, %v455_v21, -inf }
 0x321   : > { %491 = vmax.xlane.f32.xlu0 %v490_v22 }
 0x327   : > { %v457_v23 = vpop.f32.mrf.mxu0 }
 0x333   : > { %v407_v24 = vpop.f32.mrf.mxu2 }
 0x334   : > { %v484_v25 = vsel %vm483_vm7, %v407_v24, -inf }
 0x335   : > { %485 = vmax.xlane.f32.xlu2 %v484_v25 }
 0x33b   : > { %v409_v26 = vpop.f32.mrf.mxu2 }
 0x34d   : > { %373 = vrot.lane.b32.xlu2 %v1080_v43, %s952_s20  ;;  %s805_s20 = sshll.u32 %s1014_s25, 3 }
 0x378   : > { %v489_v27 = vpop.xlane.xlu2 %488 }
 0x379   : > { %v497_v30 = vsub.f32 %v431_v15, %v489_v27  ;;  %v865_v27 = vld [vmem:[%s1175_s5] ss:$0 sm:$0xff] }
 0x37b   : > { %v502_v32 = vmul.f32 1.442695, %v497_v30 }
 0x37c   : > { %v495_v28 = vpop.xlane.xlu1 %494 }
 0x37d   : > { %v499_v29 = vsub.f32 %v479_v17, %v495_v28  ;;  %v814_v17 = vld [vmem:[%s1174_s4 + $0x10] sm:$0xff] }
 0x37e   : > { %671 = vmatpush.bf16.msra.mxu2 %v814_v17 }
 0x37f   : > { %v506_v31 = vmul.f32 1.442695, %v499_v29 }
 0x381   : > { %870 = vpow2.f32 %v506_v31 }
 0x382   : > { %872 = vpow2.f32 %v502_v32  ;;  %672 = vmatpush.bf16.msra.mxu2 %v813_v18 }
 0x386   : > { %673 = vmatpush.bf16.msra.mxu2 %v812_v19 }
 0x387   : > { %v871_v33 = vpop.eup %870 }
 0x388   : > { %v517_v34 = vsel %vm483_vm7, %v871_v33, 0.0  ;;  %v873_v35 = vpop.eup %872 }
 0x389   : > { %518 = vadd.xlane.f32.xlu0 %v517_v34  ;;  %v511_v36 = vsel %vm483_vm7, %v873_v35, 0.0 }
 0x391   : > { %512 = vadd.xlane.f32.xlu0 %v511_v36 }
 0x394   : > { %v492_v37 = vpop.xlane.xlu0 %491 }
 0x395   : > { %v498_v38 = vsub.f32 %v455_v21, %v492_v37 }
 0x397   : > { %v504_v39 = vmul.f32 1.442695, %v498_v38 }
 0x399   : > { %874 = vpow2.f32 %v504_v39 }
 0x39f   : > { %v875_v40 = vpop.eup %874 }
 0x3a0   : > { %v514_v41 = vsel %vm483_vm7, %v875_v40, 0.0 }
 0x3a1   : > { %515 = vadd.xlane.f32.xlu1 %v514_v41 }
 0x3a5   : > { %379 = vrot.lane.b32.xlu0 %v1080_v43, %s951_s19  ;;  %s240_s19 = sand.u32 1, %s940_s22  }
 0x3a6   : > { %s681_s25 = scalar_lea.sflag [#allocation3], %s240_s19 }
 0x3a8   : > { %v486_v42 = vpop.xlane.xlu2 %485 }
 0x3a9   : > { %v496_v44 = vsub.f32 %v407_v24, %v486_v42 }
 0x3ab   : > { %v500_v45 = vmul.f32 1.442695, %v496_v44 }
 0x3ad   : > { %876 = vpow2.f32 %v500_v45 }
 0x3b0   : > { %v374_v46 = vpop.permute.xlu2 %373 }
 0x3b1   : > { %v383_v47 = vpack.c.bf16 %v374_v46, %v374_v46 }
 0x3b3   : > { %v877_v48 = vpop.eup %876  ;;  %v556_v49 = vsel %vm535_vm6, %v383_v47, 0 }
 0x3b4   : > { %565 = vmatpush.bf16.msrb.mxu3 %v556_v49  ;;  %v508_v50 = vsel %vm483_vm7, %v877_v48, 0.0 }
 0x3b5   : > { %509 = vadd.xlane.f32.xlu2 %v508_v50 }
 0x3ba   : > { %376 = vrot.lane.b32.xlu1 %v1080_v43, %s953_s26  ;;  %s759_s26 = sshll.u32 %s240_s19, 3 }
 0x3bb   : > { %s242_s12 = scalar_lea.vmem [#allocation2], %s759_s26 }
 0x3bc   : > { %s693_s13 = sshll.u32 %s242_s12, 4  ;;  %s694_s13 = int_to_ptr.vmem [resolvable:$true] %s693_s13 }
 0x3fc   : > { %v519_v51 = vpop.xlane.xlu0 %518 }
 0x404   : > { %v513_v52 = vpop.xlane.xlu0 %512 }
 0x405   : > { %878 = vrcp.f32 %v513_v52 }
 0x406   : > { %880 = vrcp.f32 %v519_v51 }
 0x40b   : > { %v879_v53 = vpop.eup %878 }
 0x40c   : > { %v525_v54 = vmul.f32 %v879_v53, %v873_v35  ;;  %v881_v56 = vpop.eup %880 }
 0x40d   : > { %v527_v58 = vmul.f32 %v881_v56, %v871_v33 }
 0x40e   : > { %v529_v55 = vpack.c.bf16 %v525_v54, %v525_v54 }
 0x40f   : > { %v531_v61 = vpack.c.bf16 %v527_v58, %v527_v58 }
 0x410   : > { %784 = vmatmul.msk.bf16.vlgmr.msrb.gmra.mxu3 %vm483_vm7, %v529_v55 }
 0x414   : > { %v516_v43 = vpop.xlane.xlu1 %515 }
 0x415   : > { %882 = vrcp.f32 %v516_v43 }
 0x417   : > { %v380_v57 = vpop.permute.xlu0 %379 }
 0x418   : > { %v385_v59 = vpack.c.bf16 %v380_v57, %v380_v57 }
 0x41a   : > { %v594_v60 = vsel %vm535_vm6, %v385_v59, 0 }
 0x41b   : > { %603 = vmatpush.bf16.msra.mxu1 %v594_v60  ;;  %v883_v63 = vpop.eup %882 }
 0x41c   : > { %v526_v1 = vmul.f32 %v883_v63, %v875_v40 }
 0x41e   : > { %786 = vmatmul.msk.bf16.vlgmr.msra.gmra.mxu1 %vm483_vm7, %v531_v61  ;;  %v530_v6 = vpack.c.bf16 %v526_v1, %v526_v1 }
 0x428   : > { %v510_v62 = vpop.xlane.xlu2 %509 }
 0x429   : > { %884 = vrcp.f32 %v510_v62 }
 0x42c   : > { %v377_v0 = vpop.permute.xlu1 %376 }
 0x42d   : > { %v384_v2 = vpack.c.bf16 %v377_v0, %v377_v0 }
 0x42f   : > { %v885_v3 = vpop.eup %884  ;;  %v575_v4 = vsel %vm535_vm6, %v384_v2, 0 }
 0x430   : > { %v524_v5 = vmul.f32 %v885_v3, %v877_v48  ;;  %584 = vmatpush.bf16.msra.mxu0 %v575_v4 }
 0x432   : > { %v528_v7 = vpack.c.bf16 %v524_v5, %v524_v5 }
 0x433   : > { %785 = vmatmul.msk.bf16.vlgmr.msra.gmra.mxu0 %vm483_vm7, %v530_v6 }
 0x434   : > { %783 = vmatmul.msk.bf16.vlgmr.msrb.gmra.mxu2 %vm483_vm7, %v528_v7 }
 0x493   : > { %v567_v8 = vpop.f32.mrf.mxu3 }
 0x494   : > { %610 = vrot.lane.b32.xlu0 %v567_v8, %s955_s29 }
 0x49b   : > { %v569_v9 = vpop.f32.mrf.mxu3  ;;  %v605_v10 = vpop.f32.mrf.mxu1 }
 0x49c   : > { %618 = vrot.lane.b32.xlu0 %v605_v10, %s956_s9  ;;  %s691_s9 = scalar_lea.hbm %s1176_s6, %s805_s20  ;;  %s906_s20 = scalar_lea.hbm %s1176_s6, 16 }
 0x49d   : > { %s695_s14 = sshll.u32 %s691_s9, 4  ;;  %s696_s14 = int_to_ptr.hbm [resolvable:$true] %s695_s14 }
 0x49e   : > { %s900_s15 = sshra.s32 %s696_s14, 4  ;;  %s901_s15 = int_to_ptr.hbm [resolvable:$true] %s900_s15 }
 0x49f   : > { %s902_s16 = scalar_lea.hbm %s901_s15, 8  ;;  %p907_p0 = scmp.lt.s32.totalorder %s901_s15, %s1176_s6 }
 0x4a0   : > { %p903_p11 = scmp.ne.s32.totalorder %s901_s15, %s902_s16  ;;  %p908_p1 = scmp.lt.s32.totalorder %s906_s20, %s902_s16 }
 0x4a2   : > { %p904_p12 = pnand %p903_p11, %p1031_p5  ;;  %p909_p2 = por %p908_p1, %p907_p0 }
 0x4a3   : > { %v607_v11 = vpop.f32.mrf.mxu1 }
 0x4a4   : > { %p905_p13 = pneg %p904_p12 }
 0x4a6   : > { %p910_p3 = pnand %p909_p2, %p905_p13 }
 0x4b0   : > { %v586_v12 = vpop.f32.mrf.mxu0 }
 0x4b1   : > { %614 = vrot.lane.b32.xlu1 %v586_v12, %s957_s10 }
 0x4b7   : > { %v548_v13 = vpop.f32.mrf.mxu2 }
 0x4b8   : > { %v588_v14 = vpop.f32.mrf.mxu0 }
 0x4bf   : > { %v550_v15 = vpop.f32.mrf.mxu2 }
 0x506   : > { %v611_v20 = vpop.permute.xlu0 %610 }
 0x507   : > { %v621_v21 = vsel %vm391_vm5, %v548_v13, %v611_v20 }
 0x50e   : > { %v619_v23 = vpop.permute.xlu0 %618 }
 0x523   : > { %v615_v22 = vpop.permute.xlu1 %614 }
 0x524   : > { %v622_v24 = vsel %vm249_vm0, %v621_v21, %v615_v22 }
 0x525   : > { %v624_v25 = vsel %vm623_vm8, %v622_v24, %v619_v23 }
 0x526   : > { %v625_v26 = vpack.c.bf16 %v624_v25, %v624_v25 }
 0x528   : > { %803 = vmatmul.msk.bf16.vlgmr.msra.gmra.mxu2 %vm662_vm9, %v625_v26 }
 0x5ab   : > { %v675_v28 = vpop.f32.mrf.mxu2 }
 0x5ac   : > { %v676_v29 = vadd.f32 %v865_v27, %v675_v28 }
 0x5ae   : > { %679 = vst.msk [vmem:[%s242_s12] sm:$0xff] %vm249_vm0, %v676_v29 }
 0x5af   : > { %913 = shalt.err (!%p910_p3)
}
 0x5b0   : > { %816 = dma.vmem_to_hbm [thread:$0]  (%p1031_p5), %s694_s13, 128, %s696_s14, %s681_s25  }
 0x5b3   : > { %v677_v30 = vpop.f32.mrf.mxu2 }
 0x5b4 PF: > { %p822_p4 = scmp.ge.s32.totalorder %s948_s24, 2  ;;  %s707_s19 = sand.u32 1, %s936_s21  }
 0x5b5   : > { %s708_s29 = scalar_lea.sflag [#allocation3], %s707_s19 }
 0x5b6   : > { %p819_p7 = pnand %p822_p4, %p1035_p6 }
 0x5b8   : > { %p820_p8 = pneg %p819_p7 }
 0x5ba   : > { %931 = dma.done.wait (%p820_p8), %s708_s29, 128  }
 0x5bb   : > { %933 = vsyncadd (%p820_p8), %s708_s29, 4294967168  ;;  %p16_p9 = scmp.ge.s32.totalorder %s1018_s27, 4   ;;  %s1179_s21 = smov %s940_s22 }
 0x5bc   : > { %s1180_s22 = smov %s944_s23  ;;  %s1181_s23 = smov %s1029_s30 }
 0x5bd   : > { %s1182_s24 = smov %s1018_s27  ;;  %18 = sbr.rel (!%p16_p9) target bundleno = 3 (0x3), region = 79 }
 0x5c2   :  { %714 = vsyncpa [#allocation3], 1 }
 0x5c3   :  { %716 = vsyncpa [#allocation3 + $0x1], 1 }

</bundles_post_ra>
